<compile_context>
chip_gen: v5e
topology: v5e:2x2
jax: 0.10.0
libtpu: 0.0.40
codegen_flags: <defaults>
</compile_context>

<pallas_src>
import functools

import jax
import jax.numpy as jnp
from jax.experimental import pallas as pl
from jax.experimental.pallas import tpu as pltpu


def _mlp_kernel(x_ref, w1_ref, b1_ref, w2_ref, b2_ref, w3_ref, b3_ref, o_ref,
                *, use_bf16):
    x = x_ref[...]
    w1 = w1_ref[...]
    w2 = w2_ref[...]
    w3 = w3_ref[...]
    if use_bf16:
        x = x.astype(jnp.bfloat16)
        w1 = w1.astype(jnp.bfloat16)
        w2 = w2.astype(jnp.bfloat16)
        w3 = w3.astype(jnp.bfloat16)

    # Layer 1: Linear -> ReLU (bias add + ReLU in f32 on the VPU).
    h1 = jnp.dot(x, w1, preferred_element_type=jnp.float32)
    h1 = jnp.maximum(h1 + b1_ref[...], 0.0)
    if use_bf16:
        h1 = h1.astype(jnp.bfloat16)

    # Layer 2: Linear -> Sigmoid (sigmoid on the EUP slot — cheap everywhere,
    # especially relative to the VPU on v5e).
    h2 = jnp.dot(h1, w2, preferred_element_type=jnp.float32)
    h2 = jax.nn.sigmoid(h2 + b2_ref[...])
    if use_bf16:
        h2 = h2.astype(jnp.bfloat16)

    # Output layer: Linear.
    out = jnp.dot(h2, w3, preferred_element_type=jnp.float32)
    o_ref[...] = (out + b3_ref[...]).astype(o_ref.dtype)


def _round_up(x, m):
    return ((x + m - 1) // m) * m


def hidden_relu_hidden_sigmoid(x, w1, b1, w2, b2, w3, b3, *, tm=None,
                               use_bf16=False):
    """Fused forward pass. x: [N, D_in]; wK: [in, out]; bK: [1, out]."""
    n, d_in = x.shape
    h1 = w1.shape[1]
    h2 = w2.shape[1]
    d_out = w3.shape[1]

    # Adaptive batch tile: large enough to amortize per-grid-step overhead,
    # capped at 512 rows so production batches still produce a multi-step grid
    # (lets the "parallel" axis shard across the two v7x TensorCores).
    if tm is None:
        tm = min(512, _round_up(n, 8))
    tm = max(8, _round_up(int(tm), 8))

    # Pad N to a multiple of tm; padded rows are computed and discarded.
    n_pad = _round_up(n, tm)
    if n_pad != n:
        x = jnp.pad(x, ((0, n_pad - n), (0, 0)))

    grid = (n_pad // tm,)

    def resident(shape):
        # Whole-array block whose block index never changes: fetched once and
        # kept resident in VMEM across all grid steps.
        # (For scaled-up hidden dims, add pipeline_mode=pl.Buffered(1) here to
        # single-buffer these constant blocks and halve their VMEM footprint.)
        return pl.BlockSpec(shape, lambda i: (0, 0))

    flops = 2 * n_pad * (d_in * h1 + h1 * h2 + h2 * d_out)
    bytes_accessed = 4 * (n_pad * d_in + n_pad * d_out
                          + d_in * h1 + h1 + h1 * h2 + h2 + h2 * d_out + d_out)

    out = pl.pallas_call(
        functools.partial(_mlp_kernel, use_bf16=use_bf16),
        out_shape=jax.ShapeDtypeStruct((n_pad, d_out), jnp.float32),
        grid_spec=pl.GridSpec(
            grid=grid,
            in_specs=[
                pl.BlockSpec((tm, d_in), lambda i: (i, 0)),   # x tile
                resident((d_in, h1)), resident((1, h1)),      # layer 1
                resident((h1, h2)), resident((1, h2)),        # layer 2
                resident((h2, d_out)), resident((1, d_out)),  # output layer
            ],
            # d_out (=4) < 128 lanes -> masked stores; large tm amortizes them.
            out_specs=pl.BlockSpec((tm, d_out), lambda i: (i, 0)),
        ),
        compiler_params=pltpu.CompilerParams(
            dimension_semantics=("parallel",),
            vmem_limit_bytes=64 * 1024 * 1024,
        ),
        cost_estimate=pl.CostEstimate(
            flops=flops,
            transcendentals=n_pad * h2,   # sigmoid -> exp on the EUP
            bytes_accessed=bytes_accessed,
        ),
    )(x, w1, b1, w2, b2, w3, b3)

    return out[:n] if n_pad != n else out


def _ref_forward(x, w1, b1, w2, b2, w3, b3):
    a1 = jnp.maximum(x @ w1 + b1, 0.0)
    a2 = jax.nn.sigmoid(a1 @ w2 + b2)
    return a2 @ w3 + b3


if __name__ == "__main__":
    # Small shapes consistent with the module's constructor.
    N, INPUT_DIM, HIDDEN_DIM1, HIDDEN_DIM2, OUTPUT_DIM = 16, 16, 32, 32, 4

    key = jax.random.PRNGKey(0)
    kx, k1, kb1, k2, kb2, k3, kb3 = jax.random.split(key, 7)

    x = jax.random.normal(kx, (N, INPUT_DIM), dtype=jnp.float32)

    # Deterministic parameter init (uniform, roughly nn.Linear-style scale).
    def init_linear(kw, kb, fan_in, fan_out):
        bound = 1.0 / (fan_in ** 0.5)
        w = jax.random.uniform(kw, (fan_in, fan_out), jnp.float32, -bound, bound)
        b = jax.random.uniform(kb, (1, fan_out), jnp.float32, -bound, bound)
        return w, b

    w1, b1 = init_linear(k1, kb1, INPUT_DIM, HIDDEN_DIM1)
    w2, b2 = init_linear(k2, kb2, HIDDEN_DIM1, HIDDEN_DIM2)
    w3, b3 = init_linear(k3, kb3, HIDDEN_DIM2, OUTPUT_DIM)

    ref = _ref_forward(x, w1, b1, w2, b2, w3, b3)

    # Default f32 path: tight agreement with the reference.
    out = hidden_relu_hidden_sigmoid(x, w1, b1, w2, b2, w3, b3)
    out = jax.block_until_ready(out)
    assert out.shape == (N, OUTPUT_DIM)
    assert jnp.allclose(out, ref, atol=1e-5, rtol=1e-5), "mismatch vs reference"

    # Batch size that is NOT a multiple of the tile: exercises pad-and-slice.
    x_odd = x[:13]
    out_odd = jax.block_until_ready(
        hidden_relu_hidden_sigmoid(x_odd, w1, b1, w2, b2, w3, b3))
    assert out_odd.shape == (13, OUTPUT_DIM)
    assert jnp.allclose(out_odd, ref[:13], atol=1e-5, rtol=1e-5), \
        "mismatch vs reference (padded batch)"

    # bf16 matmul-operand path (native MXU fast path on v6e/v7x) — looser tol.
    out_bf16 = jax.block_until_ready(
        hidden_relu_hidden_sigmoid(x, w1, b1, w2, b2, w3, b3, use_bf16=True))
    assert jnp.allclose(out_bf16, ref, atol=5e-2, rtol=5e-2), \
        "mismatch vs reference (bf16 path)"

    print("KERNEL_OK")
</pallas_src>

<mosaic_0001>
module attributes {stable_mosaic.version = 11 : i64} {
  func.func @_mlp_kernel(%arg0: i32, %arg1: memref<16x16xf32, #tpu.memory_space<vmem>>, %arg2: memref<16x32xf32, #tpu.memory_space<vmem>>, %arg3: memref<1x32xf32, #tpu.memory_space<vmem>>, %arg4: memref<32x32xf32, #tpu.memory_space<vmem>>, %arg5: memref<1x32xf32, #tpu.memory_space<vmem>>, %arg6: memref<32x4xf32, #tpu.memory_space<vmem>>, %arg7: memref<1x4xf32, #tpu.memory_space<vmem>>, %arg8: memref<16x4xf32, #tpu.memory_space<vmem>>) attributes {dimension_semantics = [#tpu.dimension_semantics<parallel>], iteration_bounds = array<i64: 1>, scalar_prefetch = 0 : i64, scratch_operands = 0 : i64, tpu.core_type = #tpu.core_type<tc>, window_params = [{transform_indices = @transform_0, window_bounds = array<i64: 16, 16>}, {pipeline_mode = #tpu.pipeline_mode<synchronous>, transform_indices = @transform_1, window_bounds = array<i64: 16, 32>}, {pipeline_mode = #tpu.pipeline_mode<synchronous>, transform_indices = @transform_2, window_bounds = array<i64: 1, 32>}, {pipeline_mode = #tpu.pipeline_mode<synchronous>, transform_indices = @transform_3, window_bounds = array<i64: 32, 32>}, {pipeline_mode = #tpu.pipeline_mode<synchronous>, transform_indices = @transform_4, window_bounds = array<i64: 1, 32>}, {pipeline_mode = #tpu.pipeline_mode<synchronous>, transform_indices = @transform_5, window_bounds = array<i64: 32, 4>}, {pipeline_mode = #tpu.pipeline_mode<synchronous>, transform_indices = @transform_6, window_bounds = array<i64: 1, 4>}, {transform_indices = @transform_7, window_bounds = array<i64: 16, 4>}]} {
    %c0 = arith.constant 0 : index
    %c0_0 = arith.constant 0 : index
    %0 = vector.load %arg1[%c0, %c0_0] : memref<16x16xf32, #tpu.memory_space<vmem>>, vector<16x16xf32>
    %c0_1 = arith.constant 0 : index
    %c0_2 = arith.constant 0 : index
    %1 = vector.load %arg2[%c0_1, %c0_2] : memref<16x32xf32, #tpu.memory_space<vmem>>, vector<16x32xf32>
    %c0_3 = arith.constant 0 : index
    %c0_4 = arith.constant 0 : index
    %2 = vector.load %arg4[%c0_3, %c0_4] : memref<32x32xf32, #tpu.memory_space<vmem>>, vector<32x32xf32>
    %c0_5 = arith.constant 0 : index
    %c0_6 = arith.constant 0 : index
    %3 = vector.load %arg6[%c0_5, %c0_6] : memref<32x4xf32, #tpu.memory_space<vmem>>, vector<32x4xf32>
    %cst = arith.constant dense<0.000000e+00> : vector<16x32xf32>
    %4 = tpu.matmul %0, %1, %cst {dimension_numbers = #tpu.dot_dimension_numbers<[1], [0], [0], [1], [0, 0, 1, 1], [], []>} : vector<16x16xf32>, vector<16x32xf32>, vector<16x32xf32> -> vector<16x32xf32>
    %c0_7 = arith.constant 0 : index
    %c0_8 = arith.constant 0 : index
    %5 = vector.load %arg3[%c0_7, %c0_8] : memref<1x32xf32, #tpu.memory_space<vmem>>, vector<1x32xf32>
    %6 = vector.broadcast %5 : vector<1x32xf32> to vector<16x32xf32>
    %7 = arith.addf %4, %6 : vector<16x32xf32>
    %cst_9 = arith.constant 0.000000e+00 : f32
    %8 = vector.broadcast %cst_9 : f32 to vector<16x32xf32>
    %9 = arith.maximumf %7, %8 : vector<16x32xf32>
    %cst_10 = arith.constant dense<0.000000e+00> : vector<16x32xf32>
    %10 = tpu.matmul %9, %2, %cst_10 {dimension_numbers = #tpu.dot_dimension_numbers<[1], [0], [0], [1], [0, 0, 1, 1], [], []>} : vector<16x32xf32>, vector<32x32xf32>, vector<16x32xf32> -> vector<16x32xf32>
    %c0_11 = arith.constant 0 : index
    %c0_12 = arith.constant 0 : index
    %11 = vector.load %arg5[%c0_11, %c0_12] : memref<1x32xf32, #tpu.memory_space<vmem>>, vector<1x32xf32>
    %12 = vector.broadcast %11 : vector<1x32xf32> to vector<16x32xf32>
    %13 = arith.addf %10, %12 : vector<16x32xf32>
    %14 = arith.negf %13 : vector<16x32xf32>
    %15 = math.exp %14 : vector<16x32xf32>
    %cst_13 = arith.constant 1.000000e+00 : f32
    %16 = vector.broadcast %cst_13 : f32 to vector<16x32xf32>
    %17 = arith.addf %16, %15 : vector<16x32xf32>
    %18 = arith.divf %16, %17 : vector<16x32xf32>
    %cst_14 = arith.constant dense<0.000000e+00> : vector<16x4xf32>
    %19 = tpu.matmul %18, %3, %cst_14 {dimension_numbers = #tpu.dot_dimension_numbers<[1], [0], [0], [1], [0, 0, 1, 1], [], []>} : vector<16x32xf32>, vector<32x4xf32>, vector<16x4xf32> -> vector<16x4xf32>
    %c0_15 = arith.constant 0 : index
    %c0_16 = arith.constant 0 : index
    %20 = vector.load %arg7[%c0_15, %c0_16] : memref<1x4xf32, #tpu.memory_space<vmem>>, vector<1x4xf32>
    %21 = vector.broadcast %20 : vector<1x4xf32> to vector<16x4xf32>
    %22 = arith.addf %19, %21 : vector<16x4xf32>
    %c0_17 = arith.constant 0 : index
    %c0_18 = arith.constant 0 : index
    %23 = vector.load %arg8[%c0_17, %c0_18] : memref<16x4xf32, #tpu.memory_space<vmem>>, vector<16x4xf32>
    tpu.vector_store %arg8[%c0_17, %c0_18], %22 {strides = array<i32>} : memref<16x4xf32, #tpu.memory_space<vmem>>, vector<16x4xf32>,
    return
  }
  func.func @transform_0(%arg0: i32) -> (i32, i32) {
    %c0_i32 = arith.constant 0 : i32
    %c0_i32_0 = arith.constant 0 : i32
    return %arg0, %c0_i32 : i32, i32
  }
  func.func @transform_1(%arg0: i32) -> (i32, i32) {
    %c0_i32 = arith.constant 0 : i32
    %c0_i32_0 = arith.constant 0 : i32
    %c0_i32_1 = arith.constant 0 : i32
    return %c0_i32, %c0_i32_0 : i32, i32
  }
  func.func @transform_2(%arg0: i32) -> (i32, i32) {
    %c0_i32 = arith.constant 0 : i32
    %c0_i32_0 = arith.constant 0 : i32
    %c0_i32_1 = arith.constant 0 : i32
    return %c0_i32, %c0_i32_0 : i32, i32
  }
  func.func @transform_3(%arg0: i32) -> (i32, i32) {
    %c0_i32 = arith.constant 0 : i32
    %c0_i32_0 = arith.constant 0 : i32
    %c0_i32_1 = arith.constant 0 : i32
    return %c0_i32, %c0_i32_0 : i32, i32
  }
  func.func @transform_4(%arg0: i32) -> (i32, i32) {
    %c0_i32 = arith.constant 0 : i32
    %c0_i32_0 = arith.constant 0 : i32
    %c0_i32_1 = arith.constant 0 : i32
    return %c0_i32, %c0_i32_0 : i32, i32
  }
  func.func @transform_5(%arg0: i32) -> (i32, i32) {
    %c0_i32 = arith.constant 0 : i32
    %c0_i32_0 = arith.constant 0 : i32
    %c0_i32_1 = arith.constant 0 : i32
    return %c0_i32, %c0_i32_0 : i32, i32
  }
  func.func @transform_6(%arg0: i32) -> (i32, i32) {
    %c0_i32 = arith.constant 0 : i32
    %c0_i32_0 = arith.constant 0 : i32
    %c0_i32_1 = arith.constant 0 : i32
    return %c0_i32, %c0_i32_0 : i32, i32
  }
  func.func @transform_7(%arg0: i32) -> (i32, i32) {
    %c0_i32 = arith.constant 0 : i32
    %c0_i32_0 = arith.constant 0 : i32
    return %arg0, %c0_i32 : i32, i32
  }
}

</mosaic_0001>

<bundles_post_ra>
// kernel: tpu_custom_call.1
= control target key start
LH: loop header
LB: loop body
LE: loop exit
PB: predicated region body
PF: predicated region fallthrough
CT: control target
= control target key end

     0   :  { %12 = vsyncpa [#allocation3], 0  ;;  %s392_s0 = inlined_call_operand.hbm [shape: f32[16,16], index: 0, kind: input, shape index: {}]   ;;  %s393_s1 = inlined_call_operand.hbm [shape: f32[16,32], index: 1, kind: input, shape index: {}]   ;;  %s394_s2 = inlined_call_operand.vmem [shape: f32[1,32], index: 2, kind: input, shape index: {}]   ;;  %s395_s3 = inlined_call_operand.vmem [shape: f32[32,32], index: 3, kind: input, shape index: {}]   ;;  %s396_s4 = inlined_call_operand.vmem [shape: f32[1,32], index: 4, kind: input, shape index: {}]   ;;  %s397_s5 = inlined_call_operand.vmem [shape: f32[32,4], index: 5, kind: input, shape index: {}]   ;;  %s398_s6 = inlined_call_operand.vmem [shape: f32[1,4], index: 6, kind: input, shape index: {}]   ;;  %s399_s7 = inlined_call_operand.vmem [shape: f32[16,4], index: 7, kind: output, shape index: {}]  }
   0x1   :  { %s18_s26 = sshll.u32 %s392_s0, 4  ;;  %s19_s26 = int_to_ptr.hbm [resolvable:$true] %s18_s26 }
   0x2   :  { %13 = vsyncpa [#allocation5], 0  ;;  %s299_s27 = smov [#allocation2]   ;;  %s31_s8 = sshll.u32 %s393_s1, 4  ;;  %s32_s8 = int_to_ptr.hbm [resolvable:$true] %s31_s8 }
   0x3   :  { %s20_s28 = sshll.u32 %s299_s27, 4  ;;  %s300_s9 = smov 128   ;;  %s21_s28 = int_to_ptr.vmem [resolvable:$true] %s20_s28 }
   0x4   :  { %s301_s10 = smov 8   ;;  %s302_s11 = smov [#allocation4]  }
   0x5   :  { %26 = dma.hbm_to_vmem [thread:$0]  %s19_s26, 256, %s21_s28, [#allocation3], %s300_s9, %s300_s9, %s301_s10  }
   0x6   :  { %s33_s12 = sshll.u32 %s302_s11, 4  ;;  %s34_s12 = int_to_ptr.vmem [resolvable:$true] %s33_s12 }
   0x7   :  { %39 = dma.hbm_to_vmem [thread:$0]  %s32_s8, 256, %s34_s12, [#allocation5], %s300_s9, %s300_s9, %s301_s10  }
   0x8   :  { %295 = dma.done.wait [#allocation3], 256  }
   0x9   :  { %296 = vsyncadd [#allocation3], 4294967040 }
   0xa   :  { %297 = dma.done.wait [#allocation5], 256  }
   0xb   :  { %298 = vsyncadd [#allocation5], 4294967040  ;;  %v61_v0 = vld [vmem:[#allocation4 + $0x8] sm:$0xff]  ;;  %v60_v1 = vld [vmem:[#allocation4] sm:$0xff]  ;;  %vm74_vm0 = vcmask 130048   ;;  %vm110_vm1 = vcmask 261120  }
   0xc   :  { %95 = vmatpush.msra.mxu0 %v61_v0  ;;  %v58_v2 = vld [vmem:[#allocation2] sm:$0xff]  ;;  %v65_v3 = vld [vmem:[%s395_s3 + $0x18] sm:$0xff]  ;;  %v59_v4 = vld [vmem:[#allocation2 + $0x8] sm:$0xff]  ;;  %vm211_vm10 = vcmask 31744  }
   0xd   :  { %129 = vmatpush.msra.mxu1 %v65_v3  ;;  %228 = vmatpush.msra.mxu3 %v65_v3  ;;  %v64_v5 = vld [vmem:[%s395_s3 + $0x10] sm:$0xff]  ;;  %v63_v6 = vld [vmem:[%s395_s3 + $0x8] sm:$0xff]  ;;  %v62_v7 = vld [vmem:[%s395_s3] sm:$0xff] }
   0xe   :  { %96 = vmatpush.msra.mxu0 %v60_v1  ;;  %v236_v8 = vld [vmem:[%s394_s2] ss:$0 sm:$0xff]  ;;  %v69_v15 = vld [vmem:[%s397_s5 + $0x18] sm:$0xff]  ;;  %v68_v16 = vld [vmem:[%s397_s5 + $0x10] sm:$0xff] }
   0xf   :  { %220 = vmatmul.msk.f32.vlgmr.msra.gmra.mxu0 %vm74_vm0, %v58_v2  ;;  %130 = vmatpush.msra.mxu1 %v64_v5  ;;  %v67_v17 = vld [vmem:[%s397_s5 + $0x8] sm:$0xff]  ;;  %v66_v18 = vld [vmem:[%s397_s5] sm:$0xff] }
  0x10   :  { %229 = vmatpush.msra.mxu3 %v64_v5  ;;  %200 = vmatpush.msra.mxu2 %v69_v15  ;;  %v237_v19 = vld [vmem:[%s396_s4] ss:$0 sm:$0xff] }
  0x11   :  { %131 = vmatpush.msra.mxu1 %v63_v6  ;;  %v238_v50 = vld [vmem:[%s398_s6] ss:$0 sm:$0xff] }
  0x12   :  { %230 = vmatpush.msra.mxu3 %v63_v6  ;;  %201 = vmatpush.msra.mxu2 %v68_v16 }
  0x13   :  { %132 = vmatpush.msra.mxu1 %v62_v7 }
  0x14   :  { %231 = vmatpush.msra.mxu3 %v62_v7  ;;  %202 = vmatpush.msra.mxu2 %v67_v17 }
  0x16   :  { %203 = vmatpush.msra.mxu2 %v66_v18 }
  0x17   :  { %221 = vmatmul.msk.f32.gmra.mxu0 %vm74_vm0, %v59_v4 }
  0x8c   :  { %v98_v9 = vpop.f32.mrf.mxu0 }
  0x8d   :  { %v99_v10 = vadd.f32 %v236_v8, %v98_v9 }
  0x8f   :  { %v104_v11 = vmax.f32 %v99_v10, 0.0 }
  0x91   :  { %222 = vmatmul.msk.f32.vlgmr.msra.gmra.mxu1 %vm110_vm1, %v104_v11 }
  0x94   :  { %v101_v12 = vpop.f32.mrf.mxu0 }
  0x95   :  { %v102_v13 = vadd.f32 %v236_v8, %v101_v12 }
  0x97   :  { %v105_v14 = vmax.f32 %v102_v13, 0.0 }
  0x99   :  { %223 = vmatmul.msk.f32.vlgmr.msra.gmra.mxu3 %vm110_vm1, %v105_v14 }
 0x10e   :  { %v134_v20 = vpop.f32.mrf.mxu1 }
 0x10f   :  { %v135_v21 = vadd.f32 %v237_v19, %v134_v20 }
 0x111   :  { %v224_v22 = vmul.f32 -1.442695, %v135_v21 }
 0x113   :  { %239 = vpow2.f32 %v224_v22 }
 0x119   :  { %v240_v23 = vpop.eup %239 }
 0x11a   :  { %v146_v24 = vadd.f32 1.0, %v240_v23 }
 0x11c   :  { %241 = vrcp.f32 %v146_v24  ;;  %v137_v25 = vpop.f32.mrf.mxu3  ;;  %v159_v31 = vand.u32 2147483648, %v146_v24  ;;  %v157_v34 = vand.u32 2147483647, %v146_v24  ;;  %vm153_vm3 = vweird.f32 %v146_v24 }
 0x11d   :  { %v138_v26 = vadd.f32 %v237_v19, %v137_v25 }
 0x11e   :  { %v160_v37 = vor.u32 1.1754944e-38, %v159_v31  ;;  %vm158_vm5 = vcmp.eq.f32.partialorder %v157_v34, 8.507059e+37 }
 0x11f   :  { %v225_v27 = vmul.f32 -1.442695, %v138_v26 }
 0x121   :  { %243 = vpow2.f32 %v225_v27 }
 0x122   :  { %v242_v28 = vpop.eup %241 }
 0x123   :  { %v149_v29 = vmul.f32 %v242_v28, %v146_v24  ;;  %vm154_vm2 = vweird.f32 %v242_v28 }
 0x124   :  { %vm155_vm4 = vmor %vm153_vm3, %vm154_vm2 }
 0x125   :  { %v150_v30 = vsub.f32 1.0, %v149_v29 }
 0x127   :  { %v244_v32 = vpop.eup %243  ;;  %v151_v33 = vmul.f32 %v242_v28, %v150_v30 }
 0x128   :  { %v147_v35 = vadd.f32 1.0, %v244_v32 }
 0x129   :  { %v152_v36 = vadd.f32 %v242_v28, %v151_v33 }
 0x12a   :  { %245 = vrcp.f32 %v147_v35  ;;  %v174_v43 = vand.u32 2147483648, %v147_v35  ;;  %v172_v45 = vand.u32 2147483647, %v147_v35  ;;  %vm168_vm7 = vweird.f32 %v147_v35 }
 0x12b   :  { %v156_v38 = vsel %vm155_vm4, %v242_v28, %v152_v36 }
 0x12c   :  { %v161_v39 = vsel %vm158_vm5, %v160_v37, %v156_v38  ;;  %v175_v47 = vor.u32 1.1754944e-38, %v174_v43  ;;  %vm173_vm9 = vcmp.eq.f32.partialorder %v172_v45, 8.507059e+37 }
 0x12d   :  { %226 = vmatmul.msk.f32.vlgmr.msra.gmra.mxu2 %vm110_vm1, %v161_v39 }
 0x130   :  { %v246_v40 = vpop.eup %245 }
 0x131   :  { %v164_v41 = vmul.f32 %v246_v40, %v147_v35  ;;  %vm169_vm6 = vweird.f32 %v246_v40 }
 0x132   :  { %vm170_vm8 = vmor %vm168_vm7, %vm169_vm6 }
 0x133   :  { %v165_v42 = vsub.f32 1.0, %v164_v41 }
 0x135   :  { %v166_v44 = vmul.f32 %v246_v40, %v165_v42 }
 0x137   :  { %v167_v46 = vadd.f32 %v246_v40, %v166_v44 }
 0x139   :  { %v171_v48 = vsel %vm170_vm8, %v246_v40, %v167_v46 }
 0x13a   :  { %v176_v49 = vsel %vm173_vm9, %v175_v47, %v171_v48 }
 0x13b   :  { %227 = vmatmul.msk.f32.gmra.mxu2 %vm110_vm1, %v176_v49 }
 0x1b0   :  { %v205_v51 = vpop.f32.mrf.mxu2 }
 0x1b1   :  { %v206_v52 = vadd.f32 %v238_v50, %v205_v51 }
 0x1b3   :  { %212 = vst.msk [vmem:[%s399_s7] sm:$0xff] %vm211_vm10, %v206_v52 }
 0x1be   :  { %v208_v53 = vpop.f32.mrf.mxu2 }
 0x1bf   :  { %v209_v54 = vadd.f32 %v238_v50, %v208_v53 }
 0x1c1   :  { %213 = vst.msk [vmem:[%s399_s7 + $0x8] sm:$0xff] %vm211_vm10, %v209_v54 }
 0x1c2   :  { %218 = vsyncpa [#allocation3], 1 }
 0x1c3   :  { %219 = vsyncpa [#allocation5], 1 }

</bundles_post_ra>
